<compile_context>
chip_gen: v7x
topology: tpu7x:2x2x1
jax: 0.10.0
libtpu: 0.0.40
codegen_flags: <defaults>
</compile_context>

<pallas_src>
import functools

import jax
import jax.numpy as jnp
from jax.experimental import pallas as pl
from jax.experimental.pallas import tpu as pltpu

_MiB = 1024 * 1024


def _temp_softmax_kernel(logits_ref, out_ref, *, inv_temperature, exact_recip):
    # logits_ref / out_ref: (tm, V) tile in VMEM (V = full vocab, possibly
    # not lane-aligned; Mosaic masks the pad lanes in the reductions).
    x = logits_ref[...].astype(jnp.float32)
    m = jnp.max(x, axis=-1, keepdims=True)
    # Fold the temperature into the exponent: softmax(x / T) == softmax with
    # e = exp((x - max(x)) / T).  Valid because 1/T > 0 leaves argmax intact.
    e = jnp.exp((x - m) * inv_temperature)
    denom = jnp.sum(e, axis=-1, keepdims=True)
    if exact_recip:
        p = e / denom
    else:
        p = e * pl.reciprocal(denom, approx=True)  # EUP slot, ~free (HBM-bound)
    out_ref[...] = p.astype(out_ref.dtype)


def _round_up(x, m):
    return (x + m - 1) // m * m


def _default_vmem_limit_bytes():
    """~Half of physical VMEM, clamped to [32 MiB, 64 MiB].

    v7x: 64 MiB physical per TC -> 32 MiB scoped limit.
    v5e/v6e: 128 MiB physical   -> 64 MiB scoped limit.
    """
    phys = None
    try:
        phys = getattr(pltpu.get_tpu_info(), "vmem_capacity_bytes", None)
    except Exception:
        phys = None
    if not phys:
        phys = 64 * _MiB  # conservative fallback (v7x per-TC size)
    return int(min(max(phys // 2, 32 * _MiB), 64 * _MiB))


def llm_temperature_softmax(
    logits,
    temperature: float = 0.8,
    *,
    tm: int | None = None,
    vmem_limit_bytes: int | None = None,
):
    """probs = softmax(logits / temperature, axis=-1) as a Pallas TPU kernel.

    logits: [R, V] float array (R = batch*seq rows, V = vocab).
    Input dtype is preserved for the output; math is f32 in-kernel.
    No host-side padding or slicing: ragged R / V are handled by the grid.
    """
    assert temperature > 0.0, "temperature must be > 0 for softmax sampling"
    R, V = logits.shape
    dtype = logits.dtype
    inv_t = float(1.0 / float(temperature))
    itemsize = jnp.dtype(dtype).itemsize

    if vmem_limit_bytes is None:
        vmem_limit_bytes = _default_vmem_limit_bytes()

    if tm is None:
        # (a) VMEM bound: I/O double-buffers + ~3 f32 temporaries per row.
        per_row_bytes = 2 * 2 * V * itemsize + 3 * V * 4
        budget = int(vmem_limit_bytes * 3) // 4  # headroom for compiler scratch
        tm_vmem = max(8, (budget // per_row_bytes) // 8 * 8)
        # (b) Bytes-per-step target: ~8 MiB read+write per grid step is enough
        #     to sit at the HBM roofline without starving the pipeline.
        tm_step = max(8, ((8 * _MiB) // (2 * V * itemsize)) // 8 * 8)
        # (c) Keep >= ~4 grid steps when R permits (2 TCs x double-buffer).
        tm_grid = max(8, _round_up(pl.cdiv(R, 4), 8))
        # (d) Never exceed what the input actually has.
        tm_rows = max(8, _round_up(R, 8))
        tm = min(tm_vmem, tm_step, tm_grid, tm_rows)
    assert tm % 8 == 0, "row tile must be a multiple of 8 (sublane)"

    kernel = functools.partial(
        _temp_softmax_kernel,
        inv_temperature=inv_t,
        exact_recip=(dtype == jnp.float32),
    )

    # Block last dim equals the full V (legal for any V); rows use a partial
    # last block when tm does not divide R (OOB reads are garbage confined to
    # the padded rows, OOB writes are discarded).
    grid = (pl.cdiv(R, tm),)
    cost = pl.CostEstimate(
        flops=int(4 * R * V),
        transcendentals=int(R * V),
        bytes_accessed=int(2 * R * V * itemsize),
    )

    return pl.pallas_call(
        kernel,
        out_shape=jax.ShapeDtypeStruct((R, V), dtype),
        grid_spec=pl.GridSpec(
            grid=grid,
            in_specs=[pl.BlockSpec((tm, V), lambda i: (i, 0))],
            out_specs=pl.BlockSpec((tm, V), lambda i: (i, 0)),
        ),
        compiler_params=pltpu.CompilerParams(
            dimension_semantics=("parallel",),
            vmem_limit_bytes=vmem_limit_bytes,
        ),
        cost_estimate=cost,
    )(logits)


if __name__ == "__main__":
    T = 0.8  # module default temperature
    key = jax.random.PRNGKey(0)

    # Case 1: small lane-aligned shapes (batch=2, seq=8, vocab=128), f32.
    B, S, V = 2, 8, 128
    logits = jax.random.normal(key, (B, S, V), dtype=jnp.float32)
    probs = llm_temperature_softmax(logits.reshape(B * S, V), temperature=T)
    probs = jax.block_until_ready(probs).reshape(B, S, V)
    ref = jax.nn.softmax(logits / T, axis=-1)
    assert jnp.allclose(probs, ref, atol=1e-5, rtol=1e-5)
    assert jnp.allclose(jnp.sum(probs, axis=-1), 1.0, atol=1e-4)

    # Case 2: ragged vocab (V=100) and ragged rows (R=10) — handled entirely
    # in-kernel (no host-side pad/slice), f32.
    logits2 = jax.random.normal(jax.random.PRNGKey(1), (10, 100), dtype=jnp.float32)
    probs2 = jax.block_until_ready(llm_temperature_softmax(logits2, temperature=T))
    ref2 = jax.nn.softmax(logits2 / T, axis=-1)
    assert probs2.shape == (10, 100)
    assert jnp.allclose(probs2, ref2, atol=1e-5, rtol=1e-5)
    assert jnp.allclose(jnp.sum(probs2, axis=-1), 1.0, atol=1e-4)

    # Case 3: bf16 logits stay bf16 end-to-end (f32 math inside the kernel,
    # approx EUP reciprocal is fine at bf16 output precision).
    logits3 = jax.random.normal(jax.random.PRNGKey(2), (16, 256), dtype=jnp.bfloat16)
    probs3 = jax.block_until_ready(llm_temperature_softmax(logits3, temperature=T))
    assert probs3.dtype == jnp.bfloat16
    ref3 = jax.nn.softmax(logits3.astype(jnp.float32) / T, axis=-1)
    assert jnp.allclose(probs3.astype(jnp.float32), ref3, atol=2e-2)

    print("KERNEL_OK")
</pallas_src>

<mosaic_0001>
module attributes {stable_mosaic.version = 11 : i64} {
  func.func @_temp_softmax_kernel(%arg0: i32, %arg1: memref<8x128xf32, #tpu.memory_space<vmem>>, %arg2: memref<8x128xf32, #tpu.memory_space<vmem>>) attributes {dimension_semantics = [#tpu.dimension_semantics<parallel>], iteration_bounds = array<i64: 2>, scalar_prefetch = 0 : i64, scratch_operands = 0 : i64, tpu.core_type = #tpu.core_type<tc>, window_params = [{transform_indices = @transform_0, window_bounds = array<i64: 8, 128>}, {transform_indices = @transform_1, window_bounds = array<i64: 8, 128>}]} {
    %c0 = arith.constant 0 : index
    %c0_0 = arith.constant 0 : index
    %0 = vector.load %arg1[%c0, %c0_0] : memref<8x128xf32, #tpu.memory_space<vmem>>, vector<8x128xf32>
    %cst = arith.constant dense<0xFF800000> : vector<8xf32>
    %1 = vector.multi_reduction <maximumf>, %0, %cst [1] : vector<8x128xf32> to vector<8xf32>
    %2 = vector.shape_cast %1 : vector<8xf32> to vector<8x1xf32>
    %3 = vector.broadcast %2 : vector<8x1xf32> to vector<8x128xf32>
    %4 = arith.subf %0, %3 : vector<8x128xf32>
    %cst_1 = arith.constant 1.250000e+00 : f32
    %5 = vector.broadcast %cst_1 : f32 to vector<8x128xf32>
    %6 = arith.mulf %4, %5 : vector<8x128xf32>
    %7 = math.exp %6 : vector<8x128xf32>
    %cst_2 = arith.constant dense<0.000000e+00> : vector<8xf32>
    %8 = vector.multi_reduction <add>, %7, %cst_2 [1] : vector<8x128xf32> to vector<8xf32>
    %9 = vector.shape_cast %8 : vector<8xf32> to vector<8x1xf32>
    %10 = vector.broadcast %9 : vector<8x1xf32> to vector<8x128xf32>
    %11 = arith.divf %7, %10 : vector<8x128xf32>
    %c0_3 = arith.constant 0 : index
    %c0_4 = arith.constant 0 : index
    %12 = vector.load %arg2[%c0_3, %c0_4] : memref<8x128xf32, #tpu.memory_space<vmem>>, vector<8x128xf32>
    tpu.vector_store %arg2[%c0_3, %c0_4], %11 {strides = array<i32>} : memref<8x128xf32, #tpu.memory_space<vmem>>, vector<8x128xf32>,
    return
  }
  func.func @transform_0(%arg0: i32) -> (i32, i32) {
    %c0_i32 = arith.constant 0 : i32
    %c0_i32_0 = arith.constant 0 : i32
    return %arg0, %c0_i32 : i32, i32
  }
  func.func @transform_1(%arg0: i32) -> (i32, i32) {
    %c0_i32 = arith.constant 0 : i32
    %c0_i32_0 = arith.constant 0 : i32
    return %arg0, %c0_i32 : i32, i32
  }
}

</mosaic_0001>

<bundles_post_ra>
// kernel: tpu_custom_call.1
= control target key start
LH: loop header
LB: loop body
LE: loop exit
PB: predicated region body
PF: predicated region fallthrough
CT: control target
= control target key end

     0   :  { %6 = vsyncpa [#allocation3], 0  ;;  %s561_s0 = inlined_call_operand.hbm [shape: f32[16,128], index: 0, kind: input, shape index: {}]   ;;  %s562_s1 = inlined_call_operand.hbm [shape: f32[16,128], index: 1, kind: output, shape index: {}]  }
   0x1   :  { %8 = vsyncpa [#allocation3 + $0x1], 0 }
   0x2   :  { %9 = vsyncpa [#allocation4], 0 }
   0x3   :  { %11 = vsyncpa [#allocation4 + $0x1], 0  ;;  %s400_s6 = smov 0   ;;  %s402_s7 = smov 0  }
   0x4   :  { %s404_s8 = smov 0   ;;  %s406_s9 = smov 0  }
   0x5 LB: > { %s421_s10 = sadd.s32 4294967295, %s386_s9   ;;  %s228_s11 = sadd.s32 4294967294, %s386_s9   ;;  %s386_s9 = sphi %s406_s9, %s577_s9   ;;  %s382_s8 = sphi %s404_s8, %s576_s8   ;;  %s378_s7 = sphi %s402_s7, %s575_s7   ;;  %s374_s6 = sphi %s400_s6, %s574_s6  }
   0x6   : > { %s425_s12 = sadd.s32 1, %s386_s9   ;;  %s24_s13 = sadd.s32 1, %s382_s8 }
   0x7   : > { %s21_s14 = ssub.s32 %s386_s9, %s425_s12  ;;  %p31_p0 = scmp.ne.s32.totalorder %s382_s8, %s378_s7 }
   0x8   : > { %p22_p1 = scmp.eq.s32.totalorder %s21_s14, 0  ;;  %p32_p2 = scmp.eq.s32.totalorder %s386_s9, 0 }
   0x9   : > { %p37_p3 = scmp.ne.s32.totalorder %s378_s7, %s374_s6  ;;  %p38_p4 = scmp.eq.s32.totalorder %s421_s10, 0 }
   0xa   : > { %s437_s15 = scalar_select %p22_p1, %s382_s8, %s24_s13  }
   0xb   : > { %p439_p5 = por %p32_p2, %p31_p0  ;;  %p443_p6 = por %p38_p4, %p37_p3 }
   0xc   : > { %p61_p7 = scmp.eq.s32.totalorder %s421_s10, 1  ;;  %p67_p8 = scmp.eq.s32.totalorder %s228_s11, 1 }
   0xd   : > { %p252_p10 = scmp.lt.s32.totalorder %s386_s9, 2  ;;  %s87_s20 = sand.u32 1, %s382_s8  }
   0xe   : > { %p450_p11 = por %p61_p7, %p31_p0  ;;  %p454_p12 = por %p67_p8, %p37_p3 }
   0xf   : > { %s232_s21 = sshll.u32 %s386_s9, 7  ;;  %s231_s22 = sshll.u32 %s87_s20, 3 }
  0x10   : > { %s566_s18 = scalar_select %p450_p11, 1, 0 }
  0x11   : > { %s567_s19 = scalar_select %p454_p12, 1, 0 }
  0x12   : > { %s463_s25 = scalar_lea.hbm %s561_s0, %s232_s21  ;;  %s91_s26 = scalar_lea.vmem [#allocation2], %s231_s22 }
  0x13   : > { %s98_s27 = sshll.u32 %s91_s26, 4  ;;  %p467_p13 = pnand %p252_p10, %p439_p5  ;;  %s471_s27 = int_to_ptr.vmem [resolvable:$true] %s98_s27 }
  0x14   : > { %s88_s29 = scalar_lea.sflag [#allocation3], %s87_s20  ;;  %s290_s30 = scalar_lea.hbm %s463_s25, 128 }
  0x15   : > { %p291_p2 = scmp.ne.s32.totalorder %s463_s25, %s290_s30  ;;  %p292_p3 = pneg %p467_p13 }
  0x16   : > { %s295_s4 = scalar_lea.hbm %s561_s0, 256  ;;  %p296_p5 = scmp.lt.u32.totalorder %s463_s25, %s561_s0 }
  0x17   : > { %p293_p4 = pnand %p292_p3, %p291_p2  ;;  %p297_p8 = scmp.lt.u32.totalorder %s295_s4, %s290_s30 }
  0x18   : > { %p299_p9 = scmp.lt.u32.totalorder %s290_s30, %s463_s25 }
  0x19   : > { %p294_p7 = pneg %p293_p4  ;;  %p298_p10 = por %p297_p8, %p296_p5 }
  0x1b   : > { %p300_p0 = por %p299_p9, %p298_p10 }
  0x1d   : > { %p301_p1 = pnand %p300_p0, %p294_p7 }
  0x1f   : > { %304 = shalt.err (!%p301_p1)
}
  0x20   : > { %s305_s13 = scalar_lea.vmem %s471_s27, 128  ;;  %s388_s14 = smov [#allocation2]  }
  0x21   : > { %p306_p2 = scmp.ne.s32.totalorder %s471_s27, %s305_s13  ;;  %s310_s16 = sshll.u32 %s388_s14, 4  ;;  %s311_s16 = int_to_ptr.vmem [resolvable:$false] %s310_s16 }
  0x22   : > { %s312_s20 = scalar_lea.vmem %s311_s16, 256  ;;  %p313_p11 = scmp.lt.s32.totalorder %s471_s27, %s311_s16 }
  0x23   : > { %p308_p4 = pnand %p306_p2, %p292_p3  ;;  %p314_p5 = scmp.lt.s32.totalorder %s312_s20, %s305_s13 }
  0x25   : > { %p309_p12 = pneg %p308_p4  ;;  %p315_p8 = por %p314_p5, %p313_p11 }
  0x27   : > { %p316_p9 = pnand %p315_p8, %p309_p12 }
  0x29   : > { %319 = shalt.err (!%p316_p9)
}
  0x2a   : > { %247 = dma.hbm_to_vmem [thread:$0]  (!%p467_p13), %s463_s25, 128, %s471_s27, %s88_s29  }
  0x2b   : > { %p569_p0 = scmp.lt.s32.totalorder %s386_s9, 3  ;;  %p570_p1 = scmp.ge.s32.totalorder %s386_s9, 1 }
  0x2d   : > { %p104_p3 = pnand %p570_p1, %p569_p0 }
  0x2e   : > { %s505_s21 = sand.u32 (!%p104_p3), 1, %s378_s7  }
  0x2f   : > { %107 = sbr.rel (%p104_p3) target bundleno = 384 (0x180), region = 24  ;;  %s234_s22 = sshll.u32 (!%p104_p3), %s505_s21, 3 }
  0x30   : > { %s110_s23 = scalar_lea.sflag (!%p104_p3), [#allocation3], %s505_s21  ;;  %s113_s24 = scalar_lea.vmem (!%p104_p3), [#allocation2], %s234_s22 }
  0x36   : > { %365 = dma.done.wait (%p443_p6), %s110_s23, 128  }
  0x37   : > { %367 = vsyncadd (%p443_p6), %s110_s23, 4294967168  ;;  %v132_v0 = vld [vmem:[%s113_s24] sm:$0xff]  ;;  %s237_s25 = sshll.u32 %s421_s10, 7  ;;  %s131_s26 = scalar_lea.vmem [#allocation5], %s234_s22 }
  0x38   : > { %133 = vmax.xlane.f32.xlu0 %v132_v0  ;;  %s158_s27 = sshll.u32 %s131_s26, 4  ;;  %s517_s29 = scalar_lea.hbm %s562_s1, %s237_s25  ;;  %s519_s27 = int_to_ptr.vmem [resolvable:$true] %s158_s27 }
  0x39   : > { %s145_s30 = scalar_lea.sflag [#allocation4], %s505_s21  ;;  %s320_s2 = scalar_lea.vmem %s519_s27, 128 }
  0x3a   : > { %p321_p6 = scmp.ne.s32.totalorder %s519_s27, %s320_s2  ;;  %p571_p11 = scmp.ne.s32.totalorder %s566_s18, 0 }
  0x3b   : > { %s389_s10 = smov [#allocation5]  }
  0x3c   : > { %p322_p12 = pnand %p321_p6, %p571_p11  ;;  %s324_s3 = sshll.u32 %s389_s10, 4  ;;  %s325_s3 = int_to_ptr.vmem [resolvable:$false] %s324_s3 }
  0x3d   : > { %s326_s4 = scalar_lea.vmem %s325_s3, 256  ;;  %p327_p7 = scmp.lt.s32.totalorder %s519_s27, %s325_s3 }
  0x3e   : > { %p323_p13 = pneg %p322_p12  ;;  %p328_p10 = scmp.lt.s32.totalorder %s326_s4, %s320_s2 }
  0x40   : > { %p329_p2 = por %p328_p10, %p327_p7 }
  0x42   : > { %p330_p4 = pnand %p329_p2, %p323_p13 }
  0xc5   : > { %v134_v1 = vpop.xlane.xlu0 %133 }
  0xc6   : > { %v135_v2 = vsub.f32 %v132_v0, %v134_v1 }
  0xc8   : > { %v136_v3 = vmul.f32 1.25, %v135_v2 }
  0xca   : > { %v137_v4 = vmul.f32 1.442695, %v136_v3 }
  0xcc   : > { %286 = vpow2.f32 %v137_v4 }
  0xd6   : > { %v287_v5 = vpop.eup %286 }
  0xd7   : > { %139 = vadd.xlane.f32.xlu0 %v287_v5 }
 0x164   : > { %v140_v6 = vpop.xlane.xlu0 %139 }
 0x165   : > { %288 = vrcp.f32 %v140_v6 }
 0x16f   : > { %v289_v7 = vpop.eup %288 }
 0x170   : > { %v142_v8 = vmul.f32 %v289_v7, %v287_v5 }
 0x172   : > { %143 = vst [vmem:[%s131_s26] sm:$0xff] %v142_v8 }
 0x173   : > { %333 = shalt.err (!%p330_p4)
}
 0x174   : > { %s334_s5 = scalar_lea.hbm %s517_s29, 128  ;;  %s338_s14 = scalar_lea.hbm %s562_s1, 256 }
 0x175   : > { %p335_p5 = scmp.ne.s32.totalorder %s517_s29, %s334_s5  ;;  %p339_p0 = scmp.lt.u32.totalorder %s517_s29, %s562_s1 }
 0x176   : > { %p340_p1 = scmp.lt.u32.totalorder %s338_s14, %s334_s5  ;;  %p342_p6 = scmp.lt.u32.totalorder %s334_s5, %s517_s29 }
 0x177   : > { %p336_p8 = pnand %p335_p5, %p571_p11 }
 0x178   : > { %p341_p3 = por %p340_p1, %p339_p0 }
 0x179   : > { %p337_p9 = pneg %p336_p8 }
 0x17a   : > { %p343_p12 = por %p342_p6, %p341_p3 }
 0x17c   : > { %p344_p13 = pnand %p343_p12, %p337_p9 }
 0x17e   : > { %347 = shalt.err (!%p344_p13)
}
 0x17f   : > { %242 = dma.vmem_to_hbm [thread:$0]  (%p571_p11), %s519_s27, 128, %s517_s29, %s145_s30  }
 0x180 PF: > { %s170_s21 = sand.u32 1, %s374_s6   ;;  %p572_p7 = scmp.ne.s32.totalorder %s567_s19, 0 }
 0x181   : > { %p573_p10 = scmp.ge.s32.totalorder %s386_s9, 2  ;;  %s171_s22 = scalar_lea.sflag [#allocation4], %s170_s21 }
 0x183   : > { %p249_p2 = pnand %p573_p10, %p572_p7 }
 0x185   : > { %369 = dma.done.wait (!%p249_p2), %s171_s22, 128  }
 0x186   : > { %371 = vsyncadd (!%p249_p2), %s171_s22, 4294967168  ;;  %p14_p4 = scmp.ge.s32.totalorder %s425_s12, 4   ;;  %s574_s6 = smov %s378_s7 }
 0x187   : > { %s575_s7 = smov %s382_s8  ;;  %s576_s8 = smov %s437_s15 }
 0x188   : > { %s577_s9 = smov %s425_s12  ;;  %16 = sbr.rel (!%p14_p4) target bundleno = 5 (0x5), region = 69 }
 0x18f   :  { %176 = vsyncpa [#allocation3], 1 }
 0x190   :  { %178 = vsyncpa [#allocation3 + $0x1], 1 }
 0x191   :  { %179 = vsyncpa [#allocation4], 1 }
 0x192   :  { %181 = vsyncpa [#allocation4 + $0x1], 1 }

</bundles_post_ra>
